<compile_context>
chip_gen: v7x
topology: tpu7x:2x2x1
jax: 0.10.0
libtpu: 0.0.40
codegen_flags: <defaults>
</compile_context>

<pallas_src>
import math
from functools import partial

import jax
import jax.numpy as jnp
from jax import lax
from jax.experimental import pallas as pl
from jax.experimental.pallas import tpu as pltpu

BN_EPS = 1e-5
LOG_SQRT_2PI = 0.5 * math.log(2.0 * math.pi)
OUT_W = 128  # lane-dense packed output width


def _round_up(x, m):
    return (x + m - 1) // m * m


def _w_offsets(S, H0):
    """Row offsets of the three packed weight blocks inside the weight slab."""
    r0 = 0
    r1 = _round_up(2 * S, 8)
    r2 = r1 + _round_up(2 * H0, 8)
    return r0, r1, r2


# ---------------------------------------------------------------------------
# Fused kernel
# ---------------------------------------------------------------------------
def ppo_agent_kernel(state_ref, noise_ref, vec_ref, w_ref, out_ref, *,
                     S, H0, H1, A, head_w, w_offs):
    r0, r1, r2 = w_offs
    TB = state_ref.shape[0]

    x = state_ref[...]                                    # (TB, S)
    noise = noise_ref[...]                                # (TB, A)

    # Duplicate features so one block-diagonal matmul covers actor & critic.
    x2 = jnp.concatenate([x, x], axis=-1)                 # (TB, 2S)

    # Packed vectors: row0/1 = per-call folded BN scale/shift, rows 2..4 = biases.
    scale2 = vec_ref[0:1, 0:2 * S]
    shift2 = vec_ref[1:2, 0:2 * S]
    b0 = vec_ref[2:3, 0:2 * H0]
    b1 = vec_ref[3:4, 0:2 * H1]
    b2 = vec_ref[4:5, 0:head_w]

    x2 = x2 * scale2 + shift2                             # BN (training-mode, folded)

    # Packed block-diagonal weights.
    w0 = w_ref[r0:r0 + 2 * S, 0:2 * H0]                   # [aW0 0; 0 cW0]
    w1 = w_ref[r1:r1 + 2 * H0, 0:2 * H1]                  # [aW1 0; 0 cW1]
    w2 = w_ref[r2:r2 + 2 * H1, 0:head_w]                  # [muW lvW 0; 0 0 vW]

    h = jnp.maximum(jnp.dot(x2, w0, preferred_element_type=jnp.float32) + b0, 0.0)
    h = jnp.maximum(jnp.dot(h, w1, preferred_element_type=jnp.float32) + b1, 0.0)
    head = jnp.dot(h, w2, preferred_element_type=jnp.float32) + b2   # (TB, 2A+1)

    mu = jnp.tanh(head[:, 0:A])
    log_var = -jnp.maximum(head[:, A:2 * A], 0.0)
    value = head[:, 2 * A:2 * A + 1]

    half_lv = 0.5 * log_var
    sigma = jnp.exp(half_lv)                              # exp(log_var).sqrt()
    action = mu + sigma * noise                           # Normal(mu, sigma).sample()

    # log N(action | mu, sigma) with action - mu == sigma * noise:
    log_prob = jnp.sum(-0.5 * noise * noise - half_lv - LOG_SQRT_2PI,
                       axis=-1, keepdims=True)            # (TB, 1)
    entropy = 0.5 + LOG_SQRT_2PI + half_lv                # (TB, A)

    pad = jnp.zeros((TB, OUT_W - (2 * A + 2)), jnp.float32)
    out_ref[...] = jnp.concatenate([action, entropy, log_prob, value, pad],
                                   axis=-1)


# ---------------------------------------------------------------------------
# Wrapper
# ---------------------------------------------------------------------------
@partial(jax.jit, static_argnums=(3,))
def ppo_agent_forward(state, noise, packed, dims):
    S, H0, H1, A = dims
    head_w = 2 * A + 1
    B = state.shape[0]

    # --- training-mode BatchNorm1d statistics over the *full* batch (hoisted
    # so that batch-tiling inside the kernel keeps BN semantics correct) ---
    mean = jnp.mean(state, axis=0, keepdims=True)
    var = jnp.mean(jnp.square(state - mean), axis=0, keepdims=True)
    inv_std = lax.rsqrt(var + BN_EPS)

    gamma2 = packed["gamma2"]                  # (1, 2S) = [actor | critic]
    beta2 = packed["beta2"]
    inv2 = jnp.concatenate([inv_std, inv_std], axis=-1)
    mean2 = jnp.concatenate([mean, mean], axis=-1)
    scale2 = gamma2 * inv2                     # y = x * scale + shift
    shift2 = beta2 - gamma2 * mean2 * inv2

    vec = packed["vec_base"]                   # (8, VEC_W): rows 2..4 hold biases
    vec = lax.dynamic_update_slice(vec, scale2, (0, 0))
    vec = lax.dynamic_update_slice(vec, shift2, (1, 0))

    # --- batch padding / tiling (weights stay VMEM-resident across tiles) ---
    TB = min(_round_up(B, 8), 256)
    Bp = _round_up(B, TB)
    if Bp != B:
        state = jnp.pad(state, ((0, Bp - B), (0, 0)))
        noise = jnp.pad(noise, ((0, Bp - B), (0, 0)))
    nb = Bp // TB

    w_slab = packed["w_slab"]
    kernel = partial(ppo_agent_kernel, S=S, H0=H0, H1=H1, A=A,
                     head_w=head_w, w_offs=_w_offsets(S, H0))

    flops = 2 * Bp * (2 * S * 2 * H0 + 2 * H0 * 2 * H1 + 2 * H1 * head_w)
    bytes_accessed = 4 * (Bp * S + Bp * A + vec.size + w_slab.size + Bp * OUT_W)
    cost = pl.CostEstimate(flops=flops,
                           transcendentals=2 * Bp * A,
                           bytes_accessed=bytes_accessed)

    out = pl.pallas_call(
        kernel,
        out_shape=jax.ShapeDtypeStruct((Bp, OUT_W), jnp.float32),
        grid=(nb,),
        in_specs=[
            pl.BlockSpec((TB, S), lambda i: (i, 0)),
            pl.BlockSpec((TB, A), lambda i: (i, 0)),
            pl.BlockSpec(vec.shape, lambda i: (0, 0)),      # resident
            pl.BlockSpec(w_slab.shape, lambda i: (0, 0)),   # resident
        ],
        out_specs=pl.BlockSpec((TB, OUT_W), lambda i: (i, 0)),
        compiler_params=pltpu.CompilerParams(
            dimension_semantics=("parallel",)),
        cost_estimate=cost,
    )(state, noise, vec, w_slab)

    action = out[:B, 0:A]
    entropy = out[:B, A:2 * A]
    log_prob = out[:B, 2 * A:2 * A + 1]
    value = out[:B, 2 * A + 1:2 * A + 2]
    return action, log_prob, entropy, value


# ---------------------------------------------------------------------------
# Parameter construction / packing (host-side, once)
# ---------------------------------------------------------------------------
def xavier_uniform(key, fan_in, fan_out, gain=1.0):
    bound = gain * math.sqrt(6.0 / (fan_in + fan_out))
    return jax.random.uniform(key, (fan_in, fan_out), jnp.float32, -bound, bound)


def linear_bias(key, fan_in, fan_out):
    bound = 1.0 / math.sqrt(fan_in)
    return jax.random.uniform(key, (1, fan_out), jnp.float32, -bound, bound)


def make_params(key, state_dim, hidden, action_dim):
    # TODO(synk): kernel supports exactly len(hidden) == 2 (the general ModuleList
    # depth of the PyTorch module would need a generalized packing loop).
    ks = jax.random.split(key, 16)
    h0, h1 = hidden
    return {
        "a_gamma": jnp.ones((1, state_dim), jnp.float32),
        "a_beta": jnp.zeros((1, state_dim), jnp.float32),
        "aW0": xavier_uniform(ks[0], state_dim, h0),
        "ab0": linear_bias(ks[1], state_dim, h0),
        "aW1": xavier_uniform(ks[2], h0, h1),
        "ab1": linear_bias(ks[3], h0, h1),
        "muW": xavier_uniform(ks[4], h1, action_dim),
        "mub": linear_bias(ks[5], h1, action_dim),
        "lvW": xavier_uniform(ks[6], h1, action_dim),
        "lvb": linear_bias(ks[7], h1, action_dim),
        "c_gamma": jnp.ones((1, state_dim), jnp.float32),
        "c_beta": jnp.zeros((1, state_dim), jnp.float32),
        "cW0": xavier_uniform(ks[8], state_dim, h0),
        "cb0": linear_bias(ks[9], state_dim, h0),
        "cW1": xavier_uniform(ks[10], h0, h1),
        "cb1": linear_bias(ks[11], h0, h1),
        "vW": xavier_uniform(ks[12], h1, 1),
        "vb": linear_bias(ks[13], h1, 1),
    }


def pack_params(p, S, H0, H1, A):
    """Pack actor+critic into block-diagonal weight / bias slabs (done once)."""
    head_w = 2 * A + 1
    r0, r1, r2 = _w_offsets(S, H0)
    n_rows = _round_up(r2 + 2 * H1, 8)
    w_w = max(2 * H0, 2 * H1, head_w)

    w = jnp.zeros((n_rows, w_w), jnp.float32)
    # layer 0: [aW0 0; 0 cW0]
    w = w.at[r0:r0 + S, 0:H0].set(p["aW0"])
    w = w.at[r0 + S:r0 + 2 * S, H0:2 * H0].set(p["cW0"])
    # layer 1: [aW1 0; 0 cW1]
    w = w.at[r1:r1 + H0, 0:H1].set(p["aW1"])
    w = w.at[r1 + H0:r1 + 2 * H0, H1:2 * H1].set(p["cW1"])
    # heads: actor rows -> [muW | lvW | 0], critic rows -> [0 | 0 | vW]
    w = w.at[r2:r2 + H1, 0:A].set(p["muW"])
    w = w.at[r2:r2 + H1, A:2 * A].set(p["lvW"])
    w = w.at[r2 + H1:r2 + 2 * H1, 2 * A:2 * A + 1].set(p["vW"])

    vec_w = _round_up(max(2 * S, 2 * H0, 2 * H1, head_w), 128)
    vec = jnp.zeros((8, vec_w), jnp.float32)
    vec = vec.at[2, 0:H0].set(p["ab0"][0]).at[2, H0:2 * H0].set(p["cb0"][0])
    vec = vec.at[3, 0:H1].set(p["ab1"][0]).at[3, H1:2 * H1].set(p["cb1"][0])
    vec = vec.at[4, 0:A].set(p["mub"][0]).at[4, A:2 * A].set(p["lvb"][0])
    vec = vec.at[4, 2 * A:2 * A + 1].set(p["vb"][0])

    gamma2 = jnp.concatenate([p["a_gamma"], p["c_gamma"]], axis=-1)
    beta2 = jnp.concatenate([p["a_beta"], p["c_beta"]], axis=-1)
    return {"w_slab": w, "vec_base": vec, "gamma2": gamma2, "beta2": beta2}


# ---------------------------------------------------------------------------
# Pure-JAX reference mirroring the PyTorch forward (training-mode BN)
# ---------------------------------------------------------------------------
def reference_forward(state, noise, p):
    mean = jnp.mean(state, axis=0, keepdims=True)
    var = jnp.mean((state - mean) ** 2, axis=0, keepdims=True)
    x_hat = (state - mean) / jnp.sqrt(var + BN_EPS)

    xa = x_hat * p["a_gamma"] + p["a_beta"]
    h = jax.nn.relu(xa @ p["aW0"] + p["ab0"])
    h = jax.nn.relu(h @ p["aW1"] + p["ab1"])
    mu = jnp.tanh(h @ p["muW"] + p["mub"])
    log_var = -jax.nn.relu(h @ p["lvW"] + p["lvb"])
    sigma = jnp.sqrt(jnp.exp(log_var))
    action = mu + sigma * noise
    log_prob = (-((action - mu) ** 2) / (2 * sigma ** 2)
                - jnp.log(sigma) - LOG_SQRT_2PI)
    log_prob = jnp.sum(log_prob, axis=-1, keepdims=True)
    entropy = 0.5 + LOG_SQRT_2PI + jnp.log(sigma)

    xc = x_hat * p["c_gamma"] + p["c_beta"]
    hc = jax.nn.relu(xc @ p["cW0"] + p["cb0"])
    hc = jax.nn.relu(hc @ p["cW1"] + p["cb1"])
    v = hc @ p["vW"] + p["vb"]
    return action, log_prob, entropy, v


if __name__ == "__main__":
    B, STATE_DIM, ACTION_DIM = 8, 16, 4
    HIDDEN = (32, 32)

    key = jax.random.PRNGKey(0)
    k_state, k_noise, k_params = jax.random.split(key, 3)

    state = jax.random.normal(k_state, (B, STATE_DIM), jnp.float32)
    noise = jax.random.normal(k_noise, (B, ACTION_DIM), jnp.float32)
    params = make_params(k_params, STATE_DIM, HIDDEN, ACTION_DIM)
    packed = pack_params(params, STATE_DIM, HIDDEN[0], HIDDEN[1], ACTION_DIM)
    dims = (STATE_DIM, HIDDEN[0], HIDDEN[1], ACTION_DIM)

    action, log_prob, entropy, value = jax.block_until_ready(
        ppo_agent_forward(state, noise, packed, dims))

    # sanity check against pure-JAX reference
    ref = reference_forward(state, noise, params)
    names = ("action", "log_prob", "entropy", "value")
    for name, got, want in zip(names, (action, log_prob, entropy, value), ref):
        assert got.shape == want.shape, (name, got.shape, want.shape)
        assert jnp.allclose(got, want, atol=1e-4, rtol=1e-4), name

    print("KERNEL_OK")
</pallas_src>

<mosaic_0001>
module attributes {stable_mosaic.version = 11 : i64} {
  func.func @ppo_agent_kernel(%arg0: i32, %arg1: memref<8x16xf32, #tpu.memory_space<vmem>>, %arg2: memref<8x4xf32, #tpu.memory_space<vmem>>, %arg3: memref<8x128xf32, #tpu.memory_space<vmem>>, %arg4: memref<160x64xf32, #tpu.memory_space<vmem>>, %arg5: memref<8x128xf32, #tpu.memory_space<vmem>>) attributes {dimension_semantics = [#tpu.dimension_semantics<parallel>], iteration_bounds = array<i64: 1>, scalar_prefetch = 0 : i64, scratch_operands = 0 : i64, tpu.core_type = #tpu.core_type<tc>, window_params = [{transform_indices = @transform_0, window_bounds = array<i64: 8, 16>}, {transform_indices = @transform_1, window_bounds = array<i64: 8, 4>}, {pipeline_mode = #tpu.pipeline_mode<synchronous>, transform_indices = @transform_2, window_bounds = array<i64: 8, 128>}, {pipeline_mode = #tpu.pipeline_mode<synchronous>, transform_indices = @transform_3, window_bounds = array<i64: 160, 64>}, {transform_indices = @transform_4, window_bounds = array<i64: 8, 128>}]} {
    %c0 = arith.constant 0 : index
    %c0_0 = arith.constant 0 : index
    %0 = vector.load %arg1[%c0, %c0_0] : memref<8x16xf32, #tpu.memory_space<vmem>>, vector<8x16xf32>
    %c0_1 = arith.constant 0 : index
    %c0_2 = arith.constant 0 : index
    %1 = vector.load %arg2[%c0_1, %c0_2] : memref<8x4xf32, #tpu.memory_space<vmem>>, vector<8x4xf32>
    %2 = tpu.concatenate %0, %0 in 1 : vector<8x16xf32>, vector<8x16xf32> -> vector<8x32xf32>
    %c0_3 = arith.constant 0 : index
    %c0_4 = arith.constant 0 : index
    %3 = vector.load %arg3[%c0_3, %c0_4] : memref<8x128xf32, #tpu.memory_space<vmem>>, vector<1x32xf32>
    %c1 = arith.constant 1 : index
    %c0_5 = arith.constant 0 : index
    %4 = vector.load %arg3[%c1, %c0_5] : memref<8x128xf32, #tpu.memory_space<vmem>>, vector<1x32xf32>
    %c2 = arith.constant 2 : index
    %c0_6 = arith.constant 0 : index
    %5 = vector.load %arg3[%c2, %c0_6] : memref<8x128xf32, #tpu.memory_space<vmem>>, vector<1x64xf32>
    %c3 = arith.constant 3 : index
    %c0_7 = arith.constant 0 : index
    %6 = vector.load %arg3[%c3, %c0_7] : memref<8x128xf32, #tpu.memory_space<vmem>>, vector<1x64xf32>
    %c4 = arith.constant 4 : index
    %c0_8 = arith.constant 0 : index
    %7 = vector.load %arg3[%c4, %c0_8] : memref<8x128xf32, #tpu.memory_space<vmem>>, vector<1x9xf32>
    %8 = vector.broadcast %3 : vector<1x32xf32> to vector<8x32xf32>
    %9 = arith.mulf %2, %8 : vector<8x32xf32>
    %10 = vector.broadcast %4 : vector<1x32xf32> to vector<8x32xf32>
    %11 = arith.addf %9, %10 : vector<8x32xf32>
    %c0_9 = arith.constant 0 : index
    %c0_10 = arith.constant 0 : index
    %12 = vector.load %arg4[%c0_9, %c0_10] : memref<160x64xf32, #tpu.memory_space<vmem>>, vector<32x64xf32>
    %c32 = arith.constant 32 : index
    %c0_11 = arith.constant 0 : index
    %13 = vector.load %arg4[%c32, %c0_11] : memref<160x64xf32, #tpu.memory_space<vmem>>, vector<64x64xf32>
    %c96 = arith.constant 96 : index
    %c0_12 = arith.constant 0 : index
    %14 = vector.load %arg4[%c96, %c0_12] : memref<160x64xf32, #tpu.memory_space<vmem>>, vector<64x9xf32>
    %cst = arith.constant dense<0.000000e+00> : vector<8x64xf32>
    %15 = tpu.matmul %11, %12, %cst {dimension_numbers = #tpu.dot_dimension_numbers<[1], [0], [0], [1], [0, 0, 1, 1], [], []>} : vector<8x32xf32>, vector<32x64xf32>, vector<8x64xf32> -> vector<8x64xf32>
    %16 = vector.broadcast %5 : vector<1x64xf32> to vector<8x64xf32>
    %17 = arith.addf %15, %16 : vector<8x64xf32>
    %cst_13 = arith.constant 0.000000e+00 : f32
    %18 = vector.broadcast %cst_13 : f32 to vector<8x64xf32>
    %19 = arith.maximumf %17, %18 : vector<8x64xf32>
    %cst_14 = arith.constant dense<0.000000e+00> : vector<8x64xf32>
    %20 = tpu.matmul %19, %13, %cst_14 {dimension_numbers = #tpu.dot_dimension_numbers<[1], [0], [0], [1], [0, 0, 1, 1], [], []>} : vector<8x64xf32>, vector<64x64xf32>, vector<8x64xf32> -> vector<8x64xf32>
    %21 = vector.broadcast %6 : vector<1x64xf32> to vector<8x64xf32>
    %22 = arith.addf %20, %21 : vector<8x64xf32>
    %cst_15 = arith.constant 0.000000e+00 : f32
    %23 = vector.broadcast %cst_15 : f32 to vector<8x64xf32>
    %24 = arith.maximumf %22, %23 : vector<8x64xf32>
    %cst_16 = arith.constant dense<0.000000e+00> : vector<8x9xf32>
    %25 = tpu.matmul %24, %14, %cst_16 {dimension_numbers = #tpu.dot_dimension_numbers<[1], [0], [0], [1], [0, 0, 1, 1], [], []>} : vector<8x64xf32>, vector<64x9xf32>, vector<8x9xf32> -> vector<8x9xf32>
    %26 = vector.broadcast %7 : vector<1x9xf32> to vector<8x9xf32>
    %27 = arith.addf %25, %26 : vector<8x9xf32>
    %28 = vector.extract_strided_slice %27 {offsets = [0, 0], sizes = [8, 4], strides = [1, 1]} : vector<8x9xf32> to vector<8x4xf32>
    %29 = math.tanh %28 : vector<8x4xf32>
    %30 = vector.extract_strided_slice %27 {offsets = [0, 4], sizes = [8, 4], strides = [1, 1]} : vector<8x9xf32> to vector<8x4xf32>
    %cst_17 = arith.constant 0.000000e+00 : f32
    %31 = vector.broadcast %cst_17 : f32 to vector<8x4xf32>
    %32 = arith.maximumf %30, %31 : vector<8x4xf32>
    %cst_18 = arith.constant 0.000000e+00 : f32
    %33 = vector.broadcast %cst_18 : f32 to vector<8x4xf32>
    %34 = arith.subf %33, %32 : vector<8x4xf32>
    %35 = vector.extract_strided_slice %27 {offsets = [0, 8], sizes = [8, 1], strides = [1, 1]} : vector<8x9xf32> to vector<8x1xf32>
    %cst_19 = arith.constant 5.000000e-01 : f32
    %36 = vector.broadcast %cst_19 : f32 to vector<8x4xf32>
    %37 = arith.mulf %36, %34 : vector<8x4xf32>
    %38 = math.exp %37 : vector<8x4xf32>
    %39 = arith.mulf %38, %1 : vector<8x4xf32>
    %40 = arith.addf %29, %39 : vector<8x4xf32>
    %cst_20 = arith.constant -5.000000e-01 : f32
    %41 = vector.broadcast %cst_20 : f32 to vector<8x4xf32>
    %42 = arith.mulf %41, %1 : vector<8x4xf32>
    %43 = arith.mulf %42, %1 : vector<8x4xf32>
    %44 = arith.subf %43, %37 : vector<8x4xf32>
    %cst_21 = arith.constant 0.918938517 : f32
    %45 = vector.broadcast %cst_21 : f32 to vector<8x4xf32>
    %46 = arith.subf %44, %45 : vector<8x4xf32>
    %cst_22 = arith.constant dense<0.000000e+00> : vector<8xf32>
    %47 = vector.multi_reduction <add>, %46, %cst_22 [1] : vector<8x4xf32> to vector<8xf32>
    %48 = vector.shape_cast %47 : vector<8xf32> to vector<8x1xf32>
    %cst_23 = arith.constant 1.41893852 : f32
    %49 = vector.broadcast %cst_23 : f32 to vector<8x4xf32>
    %50 = arith.addf %49, %37 : vector<8x4xf32>
    %cst_24 = arith.constant 0.000000e+00 : f32
    %51 = vector.broadcast %cst_24 : f32 to vector<8x118xf32>
    %52 = tpu.concatenate %40, %50, %48, %35, %51 in 1 : vector<8x4xf32>, vector<8x4xf32>, vector<8x1xf32>, vector<8x1xf32>, vector<8x118xf32> -> vector<8x128xf32>
    %c0_25 = arith.constant 0 : index
    %c0_26 = arith.constant 0 : index
    %53 = vector.load %arg5[%c0_25, %c0_26] : memref<8x128xf32, #tpu.memory_space<vmem>>, vector<8x128xf32>
    tpu.vector_store %arg5[%c0_25, %c0_26], %52 {strides = array<i32>} : memref<8x128xf32, #tpu.memory_space<vmem>>, vector<8x128xf32>,
    return
  }
  func.func @transform_0(%arg0: i32) -> (i32, i32) {
    %c0_i32 = arith.constant 0 : i32
    %c0_i32_0 = arith.constant 0 : i32
    return %arg0, %c0_i32 : i32, i32
  }
  func.func @transform_1(%arg0: i32) -> (i32, i32) {
    %c0_i32 = arith.constant 0 : i32
    %c0_i32_0 = arith.constant 0 : i32
    return %arg0, %c0_i32 : i32, i32
  }
  func.func @transform_2(%arg0: i32) -> (i32, i32) {
    %c0_i32 = arith.constant 0 : i32
    %c0_i32_0 = arith.constant 0 : i32
    %c0_i32_1 = arith.constant 0 : i32
    return %c0_i32, %c0_i32_0 : i32, i32
  }
  func.func @transform_3(%arg0: i32) -> (i32, i32) {
    %c0_i32 = arith.constant 0 : i32
    %c0_i32_0 = arith.constant 0 : i32
    %c0_i32_1 = arith.constant 0 : i32
    return %c0_i32, %c0_i32_0 : i32, i32
  }
  func.func @transform_4(%arg0: i32) -> (i32, i32) {
    %c0_i32 = arith.constant 0 : i32
    %c0_i32_0 = arith.constant 0 : i32
    return %arg0, %c0_i32 : i32, i32
  }
}

</mosaic_0001>

<bundles_post_ra>
// kernel: ppo_agent_forward.1
= control target key start
LH: loop header
LB: loop body
LE: loop exit
PB: predicated region body
PF: predicated region fallthrough
CT: control target
= control target key end

     0   :  { %v462_v1 = vmov 0.0|0.0   ;;  %vm463_vm0 = vmmov 0   ;;  %v464_v4 = vmov 0.0   ;;  %s465_s21 = smov 16   ;;  %vm23_vm1 = vcmask 130048   ;;  %s466_s12 = smov 4   ;;  %s583_s0 = inlined_call_operand.vmem [shape: f32[8,16], index: 0, kind: input, shape index: {}]   ;;  %s584_s3 = inlined_call_operand.vmem [shape: f32[160,64], index: 3, kind: input, shape index: {}]   ;;  %s585_s2 = inlined_call_operand.vmem [shape: f32[8,128], index: 2, kind: input, shape index: {}]   ;;  %s586_s1 = inlined_call_operand.vmem [shape: f32[8,4], index: 1, kind: input, shape index: {}]   ;;  %s587_s4 = inlined_call_operand.vmem [shape: f32[8,128], index: 4, kind: output, shape index: {}]  }
   0x1   :  { %v17_v0 = vld [vmem:[%s583_s0] sm:$0xff]  ;;  %421 = vmatprep.subr.bf16.mxu0 %v462_v1  ;;  %v41_v3 = vld [vmem:[%s584_s3 + $0x8] sm:$0xff]  ;;  %380 = vmatprep.mubr.msk.f32.mxu0 %vm463_vm0, %v464_v4  ;;  %v42_v6 = vld [vmem:[%s584_s3 + $0x10] sm:$0xff]  ;;  %vm64_vm2 = vcmask 261120   ;;  %vm143_vm3 = vcmask 523264   ;;  %s468_s16 = smov 1  }
   0x2   :  { %v40_v2 = vld [vmem:[%s584_s3] sm:$0xff]  ;;  %20 = vrot.lane.b32.xlu0 %v17_v0, %s465_s21  ;;  %427 = vmatprep.subr.bf16.mxu1 %v462_v1  ;;  %v43_v7 = vld [vmem:[%s584_s3 + $0x18] sm:$0xff]  ;;  %v45_v9 = vld [vmem:[%s584_s3 + $0x28] sm:$0xff]  ;;  %vm319_vm4 = vcmask 31744   ;;  %vm329_vm5 = vcmask 64512   ;;  %vm331_vm6 = vcmask 72704  }
   0x3   :  { %v422_v5 = vpack.c.bf16 %v41_v3, %v40_v2  ;;  %v44_v8 = vld [vmem:[%s584_s3 + $0x20] sm:$0xff]  ;;  %399 = vmatprep.mubr.msk.f32.mxu1 %vm463_vm0, %v464_v4  ;;  %v425_v10 = vpack.c.bf16 %v43_v7, %v42_v6  ;;  %v46_v12 = vld [vmem:[%s584_s3 + $0x30] sm:$0xff]  ;;  %v47_v13 = vld [vmem:[%s584_s3 + $0x38] sm:$0xff]  ;;  %vm333_vm7 = vcmask 80896  }
   0x4   :  { %v428_v11 = vpack.c.bf16 %v45_v9, %v44_v8  ;;  %v431_v14 = vpack.c.bf16 %v47_v13, %v46_v12  ;;  %v48_v15 = vld [vmem:[%s584_s3 + $0x40] sm:$0xff]  ;;  %v49_v16 = vld [vmem:[%s584_s3 + $0x48] sm:$0xff]  ;;  %v50_v24 = vld [vmem:[%s584_s3 + $0x50] sm:$0xff] }
   0x5   :  { %423 = vmatpush3.bf16.msra.mxu0 %v422_v5  ;;  %v434_v17 = vpack.c.bf16 %v49_v16, %v48_v15  ;;  %v340_v18 = vld [vmem:[%s585_s2] ss:$0 sm:$0xff]  ;;  %v341_v20 = vld [vmem:[%s585_s2 + $0x1] ss:$0 sm:$0xff]  ;;  %v51_v25 = vld [vmem:[%s584_s3 + $0x58] sm:$0xff] }
   0x6   :  { %424 = vmatprep.subr.bf16.mxu0 %v462_v1  ;;  %429 = vmatpush3.bf16.msra.mxu1 %v428_v11  ;;  %v437_v26 = vpack.c.bf16 %v51_v25, %v50_v24  ;;  %v52_v27 = vld [vmem:[%s584_s3 + $0x60] sm:$0xff]  ;;  %v53_v28 = vld [vmem:[%s584_s3 + $0x68] sm:$0xff]  ;;  %v54_v29 = vld [vmem:[%s584_s3 + $0x70] sm:$0xff] }
   0x7   :  { %430 = vmatprep.subr.bf16.mxu1 %v462_v1  ;;  %v440_v30 = vpack.c.bf16 %v53_v28, %v52_v27  ;;  %v55_v31 = vld [vmem:[%s584_s3 + $0x78] sm:$0xff]  ;;  %v56_v33 = vld [vmem:[%s584_s3 + $0x80] sm:$0xff]  ;;  %v57_v34 = vld [vmem:[%s584_s3 + $0x88] sm:$0xff] }
   0x8   :  { %v443_v32 = vpack.c.bf16 %v55_v31, %v54_v29  ;;  %v446_v35 = vpack.c.bf16 %v57_v34, %v56_v33  ;;  %v342_v36 = vld [vmem:[%s585_s2 + $0x2] ss:$0 sm:$0xff]  ;;  %v58_v41 = vld [vmem:[%s584_s3 + $0x90] sm:$0xff]  ;;  %v59_v42 = vld [vmem:[%s584_s3 + $0x98] sm:$0xff] }
   0x9   :  { %426 = vmatpush3.bf16.msra.mxu0 %v425_v10  ;;  %v449_v43 = vpack.c.bf16 %v59_v42, %v58_v41  ;;  %v18_v44 = vld [vmem:[%s586_s1] sm:$0xff]  ;;  %s467_s1 = smov 124  }
   0xa   :  { %439 = vmatprep.subr.bf16.mxu0 %v462_v1  ;;  %432 = vmatpush3.bf16.msra.mxu1 %v431_v14  ;;  %v344_v45 = vld [vmem:[%s585_s2 + $0x3] ss:$0 sm:$0xff]  ;;  %v346_v50 = vld [vmem:[%s585_s2 + $0x4] ss:$0 sm:$0xff]  ;;  %v311_v61 = vmul.f32 -0.5, %v18_v44 }
   0xb   :  { %433 = vmatprep.subr.bf16.mxu1 %v462_v1  ;;  %302 = vrot.lane.b32.xlu1 %v18_v44, %s466_s12 }
   0xc   :  { %v312_v62 = vmul.f32 %v311_v61, %v18_v44 }
   0xe   :  { %435 = vmatpush3.bf16.msra.mxu1 %v434_v17 }
   0xf   :  { %436 = vmatprep.subr.bf16.mxu1 %v462_v1 }
  0x12   :  { %438 = vmatpush3.bf16.msra.mxu1 %v437_v26 }
  0x74   :  { %v21_v19 = vpop.permute.xlu0 %20 }
  0x75   :  { %v24_v21 = vsel %vm23_vm1, %v17_v0, %v21_v19 }
  0x76   :  { %v34_v22 = vmul.f32 %v340_v18, %v24_v21 }
  0x78   :  { %v39_v23 = vadd.f32 %v341_v20, %v34_v22 }
  0x7a   :  { %381 = vmatmul.mubr.msk.f32.vlgmr.msra.gmra.mrb[0].mxu0 %vm64_vm2, %v39_v23 }
  0x7b   :  { %418 = vmatprep.mubr.msk.f32.mxu0 %vm463_vm0, %v464_v4  ;;  %441 = vmatpush3.bf16.msra.mxu0 %v440_v30 }
  0x7c   :  { %442 = vmatprep.subr.bf16.mxu0 %v462_v1 }
  0x7d   :  { %v303_v58 = vpop.permute.xlu1 %302 }
  0x7f   :  { %444 = vmatpush3.bf16.msra.mxu0 %v443_v32 }
  0x80   :  { %445 = vmatprep.subr.bf16.mxu0 %v462_v1 }
  0x83   :  { %447 = vmatpush3.bf16.msra.mxu0 %v446_v35 }
  0x84   :  { %448 = vmatprep.subr.bf16.mxu0 %v462_v1 }
  0x87   :  { %450 = vmatpush3.bf16.msra.mxu0 %v449_v43 }
 0x14d   :  { %v134_v37 = vpop.f32.mrb[0].mxu0 }
 0x14e   :  { %v135_v38 = vadd.f32 %v342_v36, %v134_v37  ;;  %v382_v39 = vpop.f32.mrb[1].mxu0 }
 0x150   :  { %v138_v40 = vmax.f32 %v135_v38, 0.0 }
 0x152   :  { %400 = vmatmul.mubr.msk.f32.vlgmr.msra.gmra.mrb[0].mxu1 %vm143_vm3, %v138_v40 }
 0x225   :  { %v213_v46 = vpop.f32.mrb[0].mxu1 }
 0x226   :  { %v214_v47 = vadd.f32 %v344_v45, %v213_v46  ;;  %v401_v48 = vpop.f32.mrb[1].mxu1 }
 0x228   :  { %v217_v49 = vmax.f32 %v214_v47, 0.0 }
 0x22a   :  { %419 = vmatmul.mubr.msk.f32.vlgmr.msra.gmra.mrb[2].mxu0 %vm143_vm3, %v217_v49 }
 0x2fd   :  { %v291_v51 = vpop.f32.mrb[2].mxu0 }
 0x2fe   :  { %v292_v52 = vadd.f32 %v346_v50, %v291_v51  ;;  %v420_v53 = vpop.f32.mrb[3].mxu0 }
 0x300   :  { %v296_v54 = vmax.f32 %v292_v52, 0.0 }
 0x302   :  { %v297_v55 = vsub.f32 0.0, %v296_v54 }
 0x304   :  { %v298_v56 = vmul.f32 0.5, %v297_v55 }
 0x306   :  { %314 = vrot.lane.b32.xlu0 %v298_v56, %s467_s1  ;;  %v299_v57 = vmul.f32 1.442695, %v298_v56  ;;  %v323_v6 = vadd.f32 1.4189385, %v298_v56 }
 0x308   :  { %458 = vpow2.f32 %v299_v57 }
 0x309   :  { %460 = vtanh.f32 %v292_v52 }
 0x312   :  { %v459_v59 = vpop.eup %458 }
 0x313   :  { %v305_v60 = vmul.f32 %v459_v59, %v303_v58  ;;  %v461_v3 = vpop.eup %460 }
 0x315   :  { %307 = vrot.lane.b32.xlu0 %v305_v60, %s467_s1 }
 0x319   :  { %325 = vrot.lane.b32.xlu0 %v292_v52, %s468_s16 }
 0x378   :  { %v315_v63 = vpop.permute.xlu0 %314 }
 0x379   :  { %v317_v0 = vsub.f32 %v312_v62, %v315_v63 }
 0x37b   :  { %v348_v1 = vadd.f32 -0.9189385, %v317_v0 }
 0x37d   :  { %v320_v2 = vsel %vm319_vm4, %v348_v1, 0.0 }
 0x37e   :  { %321 = vadd.xlane.f32.xlu1 %v320_v2 }
 0x387   :  { %v308_v4 = vpop.permute.xlu0 %307 }
 0x388   :  { %v310_v5 = vadd.f32 %v461_v3, %v308_v4 }
 0x38a   :  { %v328_v7 = vsel %vm319_vm4, %v310_v5, %v323_v6 }
 0x38b   :  { %v326_v9 = vpop.permute.xlu0 %325 }
 0x40b   :  { %v322_v8 = vpop.xlane.xlu1 %321 }
 0x40c   :  { %v330_v10 = vsel %vm329_vm5, %v328_v7, %v322_v8 }
 0x40d   :  { %v332_v11 = vsel %vm331_vm6, %v330_v10, %v326_v9 }
 0x40e   :  { %v334_v12 = vsel %vm333_vm7, %v332_v11, 0.0 }
 0x40f   :  { %335 = vst [vmem:[%s587_s4] sm:$0xff] %v334_v12 }

</bundles_post_ra>
